<compile_context>
chip_gen: v6e
topology: v6e:2x2x1
jax: 0.10.0
libtpu: 0.0.40
codegen_flags: <defaults>
</compile_context>

<pallas_src>
import functools

import jax
import jax.numpy as jnp
from jax import lax
from jax.experimental import pallas as pl
from jax.experimental.pallas import tpu as pltpu


def _focal_loss_kernel(x_ref, tgt_ref, out_ref, *, gamma: float, n_total: int,
                       tile_n: int):
    # x_ref:   (tile_n, C)  logits tile in native dtype
    # tgt_ref: (tile_n, 1)  i32 target class indices
    # out_ref: (1, 8, 128)  f32 per-tile partial sum (broadcast into the block)
    pid = pl.program_id(0)

    tgt = tgt_ref[...]                           # (tile_n, 1) i32
    tn, c = x_ref.shape

    # Mask for tail rows of the last (padded) tile.
    row_ids = pid * tile_n + lax.broadcasted_iota(jnp.int32, (tn, 1), 0)
    valid = row_ids < n_total                    # (tile_n, 1) bool

    x = x_ref[...].astype(jnp.float32)           # f32 math in-kernel
    x = jnp.where(valid, x, 0.0)                 # keep padded rows finite (no NaN/inf)

    # Row-wise stable softmax pieces — one full-tile exp, 2 cross-lane reduces.
    m = jnp.max(x, axis=-1, keepdims=True)       # (tile_n, 1)   XLU reduce #1
    e = jnp.exp(x - m)                           # (tile_n, C)   the only big exp
    s = jnp.sum(e, axis=-1, keepdims=True)       # (tile_n, 1)   XLU reduce #2

    # Gather the target logit via one-hot select + sum (single one-hot reduce).
    col_ids = lax.broadcasted_iota(jnp.int32, (tn, c), 1)
    onehot = col_ids == tgt                      # (tile_n, C) bool
    x_t = jnp.sum(jnp.where(onehot, x, 0.0), axis=-1, keepdims=True)  # XLU reduce #3

    # CE = logsumexp(x) - x_t ;  p = exp(-CE) via a tiny (tile_n, 1) exp.
    log_s = jnp.log(s)                           # (tile_n, 1)
    ce = log_s - (x_t - m)                       # (tile_n, 1)
    p = jnp.exp((x_t - m) - log_s)               # (tile_n, 1)

    # Modulating factor (1 - p) ** gamma, clamped so a slightly-negative base
    # (p fractionally > 1 from fp rounding) can't NaN the non-integer pow path.
    base = jnp.maximum(1.0 - p, 0.0)
    if gamma == 0.0:
        mod = jnp.ones_like(base)
    elif gamma == 1.0:
        mod = base
    elif float(gamma).is_integer() and 0.0 < gamma <= 8.0:
        mod = base
        for _ in range(int(gamma) - 1):
            mod = mod * base                     # VPU multiplies, no EUP pow
    else:
        mod = base ** gamma

    loss = jnp.where(valid, mod * ce, 0.0)       # zero out padded tail rows
    partial = jnp.sum(loss)                      # scalar for this tile

    out_ref[...] = jnp.broadcast_to(partial, out_ref.shape).astype(jnp.float32)


def _vmem_limit_bytes() -> int:
    """Per-chip scoped VMEM limit: 64 MiB on 128-MiB chips, 32 MiB on v7x."""
    try:
        cap = int(pltpu.get_tpu_info().vmem_capacity_bytes)
        return min(64 << 20, max(32 << 20, cap // 2))
    except Exception:
        return 32 << 20                          # safe everywhere


def _choose_tile_n(n: int, c: int, itemsize: int, vmem_limit: int) -> int:
    """Row-tile size: big (≈8 MiB of logits), VMEM-aware, >=2 tiles, aligned."""
    # Sublane multiple by element size (f32: 8, bf16: 16, int8/fp8: 32).
    sub = {4: 8, 2: 16, 1: 32}.get(itemsize, 8)
    n_rounded = pl.cdiv(n, sub) * sub

    # HBM roofline: target ~8 MiB of logits per tile to swamp per-step overhead.
    target_bytes = 8 << 20
    t = (target_bytes // max(1, c * itemsize)) // sub * sub

    # VMEM budget: 2x double-buffered input tile + ~5x f32 intermediates
    # (f32 upcast, e, iota, one-hot select, masked loss) within 3/4 of the limit.
    per_row = 2 * c * itemsize + 5 * c * 4
    t_vmem = ((vmem_limit * 3 // 4) // max(1, per_row)) // sub * sub
    t = min(t, t_vmem)

    # Keep at least 2 grid steps so the "parallel" axis can use both v7x TCs.
    half = pl.cdiv(pl.cdiv(n_rounded, 2), sub) * sub
    t = min(t, half)

    return max(sub, min(t, n_rounded))


def focal_loss(logits: jax.Array, target: jax.Array, gamma: float = 1.0) -> jax.Array:
    """Focal loss forward. logits: (N, C) float (f32 or bf16); target: (N,) int.

    Returns the summed (scalar) focal loss, matching the PyTorch module.
    """
    n, c = logits.shape
    tgt = target.astype(jnp.int32).reshape(n, 1)

    vmem_limit = _vmem_limit_bytes()
    tile_n = _choose_tile_n(n, c, logits.dtype.itemsize, vmem_limit)
    num_tiles = pl.cdiv(n, tile_n)

    kernel = functools.partial(
        _focal_loss_kernel, gamma=float(gamma), n_total=n, tile_n=tile_n)

    cost = pl.CostEstimate(
        flops=8 * n * c,
        transcendentals=n * c + 3 * n,
        bytes_accessed=n * c * logits.dtype.itemsize + n * 4
                       + num_tiles * 8 * 128 * 4,
    )

    partials = pl.pallas_call(
        kernel,
        out_shape=jax.ShapeDtypeStruct((num_tiles, 8, 128), jnp.float32),
        grid=(num_tiles,),
        in_specs=[
            pl.BlockSpec((tile_n, c), lambda i: (i, 0)),   # logits rows tile
            pl.BlockSpec((tile_n, 1), lambda i: (i, 0)),   # target rows tile
        ],
        out_specs=pl.BlockSpec((1, 8, 128), lambda i: (i, 0, 0)),
        compiler_params=pltpu.CompilerParams(
            dimension_semantics=("parallel",),
            vmem_limit_bytes=vmem_limit,
        ),
        cost_estimate=cost,
    )(logits, tgt)

    # Tiny final reduction over per-tile partial sums.
    return jnp.sum(partials[:, 0, 0])


def _focal_loss_ref(logits, target, gamma=1.0):
    logits = logits.astype(jnp.float32)
    lse = jax.nn.logsumexp(logits, axis=-1)
    x_t = jnp.take_along_axis(logits, target[:, None].astype(jnp.int32), axis=-1)[:, 0]
    ce = lse - x_t
    p = jnp.exp(-ce)
    return jnp.sum(jnp.maximum(1.0 - p, 0.0) ** gamma * ce)


if __name__ == "__main__":
    key = jax.random.PRNGKey(0)
    k1, k2, k3, k4, k5, k6 = jax.random.split(key, 6)

    NUM_CLASSES = 80

    # Case 1: N multiple of 8, gamma = 1.0 (f32 logits).
    N1, G1 = 16, 1.0
    logits1 = jax.random.normal(k1, (N1, NUM_CLASSES), dtype=jnp.float32)
    target1 = jax.random.randint(k2, (N1,), 0, NUM_CLASSES, dtype=jnp.int32)
    out1 = jax.block_until_ready(focal_loss(logits1, target1, gamma=G1))
    ref1 = _focal_loss_ref(logits1, target1, gamma=G1)
    assert jnp.allclose(out1, ref1, rtol=2e-3, atol=1e-3), (out1, ref1)

    # Case 2: ragged N (exercises in-kernel tail-row masking), gamma = 2.0.
    N2, G2 = 13, 2.0
    logits2 = jax.random.normal(k3, (N2, NUM_CLASSES), dtype=jnp.float32)
    target2 = jax.random.randint(k4, (N2,), 0, NUM_CLASSES, dtype=jnp.int32)
    out2 = jax.block_until_ready(focal_loss(logits2, target2, gamma=G2))
    ref2 = _focal_loss_ref(logits2, target2, gamma=G2)
    assert jnp.allclose(out2, ref2, rtol=2e-3, atol=1e-3), (out2, ref2)

    # Case 3: bf16 logits (exercises 16-row sublane alignment + in-kernel f32 cast).
    N3, G3 = 32, 2.0
    logits3 = jax.random.normal(k5, (N3, NUM_CLASSES), dtype=jnp.float32).astype(jnp.bfloat16)
    target3 = jax.random.randint(k6, (N3,), 0, NUM_CLASSES, dtype=jnp.int32)
    out3 = jax.block_until_ready(focal_loss(logits3, target3, gamma=G3))
    ref3 = _focal_loss_ref(logits3, target3, gamma=G3)
    assert jnp.allclose(out3, ref3, rtol=5e-3, atol=5e-3), (out3, ref3)

    print("KERNEL_OK")
</pallas_src>

<mosaic_0001>
module attributes {stable_mosaic.version = 11 : i64} {
  func.func @_focal_loss_kernel(%arg0: i32, %arg1: memref<8x80xf32, #tpu.memory_space<vmem>>, %arg2: memref<8x1xi32, #tpu.memory_space<vmem>>, %arg3: memref<1x8x128xf32, #tpu.memory_space<vmem>>) attributes {dimension_semantics = [#tpu.dimension_semantics<parallel>], iteration_bounds = array<i64: 2>, scalar_prefetch = 0 : i64, scratch_operands = 0 : i64, tpu.core_type = #tpu.core_type<tc>, window_params = [{transform_indices = @transform_0, window_bounds = array<i64: 8, 80>}, {transform_indices = @transform_1, window_bounds = array<i64: 8, 1>}, {transform_indices = @transform_2, window_bounds = array<i64: 1, 8, 128>}]} {
    %c0 = arith.constant 0 : index
    %c0_0 = arith.constant 0 : index
    %0 = vector.load %arg2[%c0, %c0_0] : memref<8x1xi32, #tpu.memory_space<vmem>>, vector<8x1xi32>
    %c8_i32 = arith.constant 8 : i32
    %1 = arith.muli %arg0, %c8_i32 : i32
    %2 = tpu.iota {dimensions = array<i32: 0>} : vector<8x1xi32>
    %3 = vector.broadcast %1 : i32 to vector<8x1xi32>
    %4 = arith.addi %3, %2 : vector<8x1xi32>
    %c16_i32 = arith.constant 16 : i32
    %5 = vector.broadcast %c16_i32 : i32 to vector<8x1xi32>
    %6 = arith.cmpi slt, %4, %5 : vector<8x1xi32>
    %c0_1 = arith.constant 0 : index
    %c0_2 = arith.constant 0 : index
    %7 = vector.load %arg1[%c0_1, %c0_2] : memref<8x80xf32, #tpu.memory_space<vmem>>, vector<8x80xf32>
    %cst = arith.constant 0.000000e+00 : f32
    %8 = vector.shape_cast %6 : vector<8x1xi1> to vector<8x1xi1>
    %9 = vector.broadcast %8 : vector<8x1xi1> to vector<8x80xi1>
    %10 = vector.broadcast %cst : f32 to vector<8x80xf32>
    %11 = arith.select %9, %7, %10 : vector<8x80xi1>, vector<8x80xf32>
    %cst_3 = arith.constant dense<0xFF800000> : vector<8xf32>
    %12 = vector.multi_reduction <maximumf>, %11, %cst_3 [1] : vector<8x80xf32> to vector<8xf32>
    %13 = vector.shape_cast %12 : vector<8xf32> to vector<8x1xf32>
    %14 = vector.broadcast %13 : vector<8x1xf32> to vector<8x80xf32>
    %15 = arith.subf %11, %14 : vector<8x80xf32>
    %16 = math.exp %15 : vector<8x80xf32>
    %cst_4 = arith.constant dense<0.000000e+00> : vector<8xf32>
    %17 = vector.multi_reduction <add>, %16, %cst_4 [1] : vector<8x80xf32> to vector<8xf32>
    %18 = vector.shape_cast %17 : vector<8xf32> to vector<8x1xf32>
    %19 = tpu.iota {dimensions = array<i32: 1>} : vector<8x80xi32>
    %20 = vector.broadcast %0 : vector<8x1xi32> to vector<8x80xi32>
    %21 = arith.cmpi eq, %19, %20 : vector<8x80xi32>
    %cst_5 = arith.constant 0.000000e+00 : f32
    %22 = vector.broadcast %cst_5 : f32 to vector<8x80xf32>
    %23 = arith.select %21, %11, %22 : vector<8x80xi1>, vector<8x80xf32>
    %cst_6 = arith.constant dense<0.000000e+00> : vector<8xf32>
    %24 = vector.multi_reduction <add>, %23, %cst_6 [1] : vector<8x80xf32> to vector<8xf32>
    %25 = vector.shape_cast %24 : vector<8xf32> to vector<8x1xf32>
    %26 = math.log %18 : vector<8x1xf32>
    %27 = arith.subf %25, %13 : vector<8x1xf32>
    %28 = arith.subf %26, %27 : vector<8x1xf32>
    %29 = arith.subf %25, %13 : vector<8x1xf32>
    %30 = arith.subf %29, %26 : vector<8x1xf32>
    %31 = math.exp %30 : vector<8x1xf32>
    %cst_7 = arith.constant 1.000000e+00 : f32
    %32 = vector.broadcast %cst_7 : f32 to vector<8x1xf32>
    %33 = arith.subf %32, %31 : vector<8x1xf32>
    %cst_8 = arith.constant 0.000000e+00 : f32
    %34 = vector.broadcast %cst_8 : f32 to vector<8x1xf32>
    %35 = arith.maximumf %33, %34 : vector<8x1xf32>
    %36 = arith.mulf %35, %28 : vector<8x1xf32>
    %cst_9 = arith.constant 0.000000e+00 : f32
    %37 = vector.broadcast %cst_9 : f32 to vector<8x1xf32>
    %38 = arith.select %6, %36, %37 : vector<8x1xi1>, vector<8x1xf32>
    %39 = vector.shape_cast %38 : vector<8x1xf32> to vector<1x8x1xf32>
    %cst_10 = arith.constant dense<0.000000e+00> : vector<1xf32>
    %40 = vector.multi_reduction <add>, %39, %cst_10 [1, 2] : vector<1x8x1xf32> to vector<1xf32>
    %41 = vector.shape_cast %40 : vector<1xf32> to vector<1x1x1xf32>
    %42 = vector.extract %41[0, 0, 0] : f32 from vector<1x1x1xf32>
    %43 = vector.broadcast %42 : f32 to vector<1x8x128xf32>
    %c0_11 = arith.constant 0 : index
    %c0_12 = arith.constant 0 : index
    %c0_13 = arith.constant 0 : index
    %44 = vector.load %arg3[%c0_11, %c0_12, %c0_13] : memref<1x8x128xf32, #tpu.memory_space<vmem>>, vector<1x8x128xf32>
    tpu.vector_store %arg3[%c0_11, %c0_12, %c0_13], %43 {strides = array<i32>} : memref<1x8x128xf32, #tpu.memory_space<vmem>>, vector<1x8x128xf32>,
    return
  }
  func.func @transform_0(%arg0: i32) -> (i32, i32) {
    %c0_i32 = arith.constant 0 : i32
    %c0_i32_0 = arith.constant 0 : i32
    return %arg0, %c0_i32 : i32, i32
  }
  func.func @transform_1(%arg0: i32) -> (i32, i32) {
    %c0_i32 = arith.constant 0 : i32
    %c0_i32_0 = arith.constant 0 : i32
    return %arg0, %c0_i32 : i32, i32
  }
  func.func @transform_2(%arg0: i32) -> (i32, i32, i32) {
    %c0_i32 = arith.constant 0 : i32
    %c0_i32_0 = arith.constant 0 : i32
    %c0_i32_1 = arith.constant 0 : i32
    return %arg0, %c0_i32, %c0_i32_0 : i32, i32, i32
  }
}

</mosaic_0001>

<bundles_post_ra>
// kernel: tpu_custom_call.1
= control target key start
LH: loop header
LB: loop body
LE: loop exit
PB: predicated region body
PF: predicated region fallthrough
CT: control target
= control target key end

     0   :  { %7 = vsyncpa [#allocation3], 0  ;;  %s538_s0 = inlined_call_operand.vmem [shape: f32[16,80], index: 0, kind: input, shape index: {}]   ;;  %s539_s1 = inlined_call_operand.vmem [shape: s32[16,1], index: 1, kind: input, shape index: {}]   ;;  %s540_s2 = inlined_call_operand.hbm [shape: f32[2,8,128], index: 2, kind: output, shape index: {}]  }
   0x1   :  { %9 = vsyncpa [#allocation3 + $0x1], 0  ;;  %s436_s9 = smov 0   ;;  %s438_s10 = smov 0  }
   0x2   :  { %s440_s11 = smov 0   ;;  %s442_s12 = smov 0  }
   0x3 LB: > { %s457_s13 = sadd.s32 4294967295, %s417_s12   ;;  %s296_s14 = sadd.s32 4294967294, %s417_s12   ;;  %s417_s12 = sphi %s442_s12, %s546_s12   ;;  %s413_s11 = sphi %s440_s11, %s545_s11   ;;  %s409_s10 = sphi %s438_s10, %s544_s10   ;;  %s405_s9 = sphi %s436_s9, %s543_s9  }
   0x4   : > { %s461_s15 = sadd.s32 1, %s417_s12   ;;  %s74_s16 = sadd.s32 1, %s413_s11 }
   0x5   : > { %s71_s17 = ssub.s32 %s417_s12, %s461_s15  ;;  %p84_p0 = scmp.ne.s32.totalorder %s413_s11, %s409_s10 }
   0x6   : > { %p72_p1 = scmp.eq.s32.totalorder %s71_s17, 0  ;;  %p85_p2 = scmp.eq.s32.totalorder %s457_s13, 1 }
   0x7   : > { %p90_p3 = scmp.ne.s32.totalorder %s409_s10, %s405_s9  ;;  %p91_p4 = scmp.eq.s32.totalorder %s296_s14, 1 }
   0x8   : > { %s472_s18 = scalar_select %p72_p1, %s413_s11, %s74_s16  }
   0x9   : > { %p474_p5 = por %p85_p2, %p84_p0  ;;  %p478_p6 = por %p91_p4, %p90_p3 }
   0xa   : > { %p299_p7 = scmp.ge.s32.totalorder %s417_s12, 1  ;;  %p123_p8 = scmp.lt.s32.totalorder %s417_s12, 3 }
   0xc   : > { %p124_p9 = pnand %p299_p7, %p123_p8 }
   0xd   : > { %p148_p10 = scmp.lt.s32.totalorder (!%p124_p9), %s457_s13, 1  ;;  %s303_s21 = sshll.u32 (!%p124_p9), %s457_s13, 3 }
   0xe   : > { %127 = sbr.rel (%p124_p9) target bundleno = 579 (0x243), region = 28  ;;  %s145_s30 = sand.u32 (!%p124_p9), 1, %s409_s10  }
   0xf   : > { %s300_s3 = sshll.u32 (!%p124_p9), %s145_s30, 3  ;;  %s305_s6 = sshll.u32 (!%p124_p9), %s457_s13, 7 }
  0x10   : > { %s147_s4 = scalar_lea.vmem (!%p124_p9), [#allocation2], %s300_s3  ;;  %s223_s16 = scalar_lea.hbm (!%p124_p9), %s540_s2, %s305_s6 }
  0x11   : > { %s225_s5 = sshll.u32 (!%p124_p9), %s147_s4, 4  ;;  %s212_s17 = scalar_lea.sflag (!%p124_p9), [#allocation3], %s145_s30  ;;  %s500_s5 = int_to_ptr.vmem [resolvable:$true] %s225_s5 }
  0x13   : > { %v158_v0 = vlaneseq  ;;  %v160_v1 = vstv %s303_s21  ;;  %v419_v2 = vmov 0   ;;  %s149_s22 = scalar_select %p148_p10, %s457_s13, 1  ;;  %vm167_vm0 = vcmask 654336  }
  0x14   : > { %350 = vset.pattern.permute.xlu0 %v419_v2  ;;  %vm198_vm3 = vcmask 7168   ;;  %s357_s21 = scalar_lea.vmem %s500_s5, 128 }
  0x15   : > { %v159_v3 = vshrl.u32 %v158_v0, 7  ;;  %s301_s23 = sshll.u32 %s149_s22, 3  ;;  %v178_v12 = vand.u32 127, %v158_v0  ;;  %p358_p11 = scmp.ne.s32.totalorder %s500_s5, %s357_s21 }
  0x16   : > { %s151_s26 = scalar_lea.vmem %s538_s0, %s301_s23  ;;  %s155_s29 = scalar_lea.vmem %s539_s1, %s301_s23 }
  0x17   : > { %v161_v4 = vadd.s32 %v160_v1, %v159_v3  ;;  %v163_v5 = vld [vmem:[%s151_s26] sm:$0xff]  ;;  %p359_p12 = pnand %p358_p11, %p474_p5  ;;  %s420_s22 = smov [#allocation2]  }
  0x18   : > { %v156_v8 = vld [vmem:[%s155_s29] sm:$0xff]  ;;  %s361_s13 = sshll.u32 %s420_s22, 4  ;;  %s362_s13 = int_to_ptr.vmem [resolvable:$false] %s361_s13 }
  0x19   : > { %vm162_vm1 = vcmp.lt.s32.totalorder %v161_v4, 16  ;;  %p360_p13 = pneg %p359_p12  ;;  %s363_s23 = scalar_lea.vmem %s362_s13, 256 }
  0x1a   : > { %v166_v6 = vsel %vm162_vm1, %v163_v5, 0.0  ;;  %p364_p0 = scmp.lt.s32.totalorder %s500_s5, %s362_s13  ;;  %p365_p1 = scmp.lt.s32.totalorder %s363_s23, %s357_s21 }
  0x1b   : > { %v168_v7 = vsel %vm167_vm0, %v166_v6, -inf }
  0x1c   : > { %169 = vmax.xlane.f32.xlu0 %v168_v7  ;;  %p366_p2 = por %p365_p1, %p364_p0 }
  0x1e   : > { %p367_p3 = pnand %p366_p2, %p360_p13 }
  0x32   : > { %180 = vperm.xlu0 %350, %v156_v8  }
  0xa5   : > { %v170_v9 = vpop.xlane.xlu0 %169 }
  0xa6   : > { %v171_v10 = vsub.f32 %v166_v6, %v170_v9 }
  0xa8   : > { %v172_v11 = vmul.f32 1.442695, %v171_v10 }
  0xaa   : > { %351 = vpow2.f32 %v172_v11 }
  0xad   : > { %v181_v13 = vpop.permute.xlu0 %180 }
  0xae   : > { %vm182_vm2 = vcmp.eq.s32.totalorder %v178_v12, %v181_v13 }
  0xaf   : > { %v183_v15 = vsel %vm182_vm2, %v166_v6, 0.0 }
  0xb0   : > { %v184_v17 = vsel %vm167_vm0, %v183_v15, 0.0 }
  0xb7   : > { %v352_v14 = vpop.eup %351 }
  0xb8   : > { %v174_v16 = vsel %vm167_vm0, %v352_v14, 0.0 }
  0xb9   : > { %175 = vadd.xlane.f32.xlu1 %v174_v16 }
  0xbd   : > { %185 = vadd.xlane.f32.xlu1 %v184_v17 }
 0x142   : > { %v176_v18 = vpop.xlane.xlu1 %175 }
 0x143   : > { %353 = vlog2.f32 %v176_v18 }
 0x146   : > { %v186_v19 = vpop.xlane.xlu1 %185 }
 0x147   : > { %v189_v22 = vsub.f32 %v186_v19, %v170_v9 }
 0x150   : > { %v354_v20 = vpop.eup %353 }
 0x151   : > { %v188_v21 = vmul.f32 0.6931472, %v354_v20 }
 0x153   : > { %v191_v23 = vsub.f32 %v189_v22, %v188_v21  ;;  %v190_v27 = vsub.f32 %v188_v21, %v189_v22 }
 0x155   : > { %v192_v24 = vmul.f32 1.442695, %v191_v23 }
 0x157   : > { %355 = vpow2.f32 %v192_v24 }
 0x164   : > { %v356_v25 = vpop.eup %355 }
 0x165   : > { %v194_v26 = vsub.f32 1.0, %v356_v25 }
 0x167   : > { %v195_v28 = vmax.f32 %v194_v26, 0.0 }
 0x169   : > { %v196_v29 = vmul.f32 %v195_v28, %v190_v27 }
 0x16b   : > { %v197_v30 = vsel %vm162_vm1, %v196_v29, 0.0 }
 0x16c   : > { %v199_v31 = vsel %vm198_vm3, %v197_v30, 0.0 }
 0x16d   : > { %200 = vadd.xlane.f32.xlu1 %v199_v31 }
 0x1f6   : > { %v201_v32 = vpop.xlane.xlu1 %200 }
 0x1f7   : > { %v202_v33 = vrot.slane %v201_v32, 4 }
 0x1f9   : > { %v203_v34 = vadd.f32 %v202_v33, %v201_v32 }
 0x1fb   : > { %v204_v35 = vrot.slane %v203_v34, 2 }
 0x1fd   : > { %v205_v36 = vadd.f32 %v204_v35, %v203_v34 }
 0x1ff   : > { %v206_v37 = vrot.slane %v205_v36, 1 }
 0x201   : > { %v207_v38 = vadd.f32 %v206_v37, %v205_v36 }
 0x203   : > { %308 = vpush %v207_v38 }
 0x234   : > { %s309_s7 = spop %308 }
 0x235   : > { %v209_v39 = vstv %s309_s7 }
 0x236   : > { %210 = vst [vmem:[%s147_s4] sm:$0xff] %v209_v39 }
 0x237   : > { %370 = shalt.err (!%p367_p3)
}
 0x238   : > { %s371_s24 = scalar_lea.hbm %s223_s16, 128  ;;  %s375_s27 = scalar_lea.hbm %s540_s2, 256 }
 0x239   : > { %p372_p4 = scmp.ne.s32.totalorder %s223_s16, %s371_s24  ;;  %p376_p9 = scmp.lt.s32.totalorder %s223_s16, %s540_s2 }
 0x23a   : > { %p377_p10 = scmp.lt.s32.totalorder %s375_s27, %s371_s24 }
 0x23b   : > { %p373_p7 = pnand %p372_p4, %p474_p5 }
 0x23c   : > { %p378_p11 = por %p377_p10, %p376_p9 }
 0x23d   : > { %p374_p8 = pneg %p373_p7 }
 0x23f   : > { %p379_p12 = pnand %p378_p11, %p374_p8 }
 0x241   : > { %382 = shalt.err (!%p379_p12)
}
 0x242   : > { %310 = dma.vmem_to_hbm [thread:$0]  (%p474_p5), %s500_s5, 128, %s223_s16, %s212_s17  }
 0x243 PF: > { %p316_p13 = scmp.ge.s32.totalorder %s417_s12, 2  ;;  %s237_s30 = sand.u32 1, %s405_s9  }
 0x244   : > { %s238_s3 = scalar_lea.sflag [#allocation3], %s237_s30 }
 0x245   : > { %p313_p0 = pnand %p316_p13, %p478_p6 }
 0x247   : > { %p314_p1 = pneg %p313_p0 }
 0x249   : > { %400 = dma.done.wait (%p314_p1), %s238_s3, 128  }
 0x24a   : > { %402 = vsyncadd (%p314_p1), %s238_s3, 4294967168  ;;  %p12_p2 = scmp.ge.s32.totalorder %s461_s15, 4   ;;  %s543_s9 = smov %s409_s10 }
 0x24b   : > { %s544_s10 = smov %s413_s11  ;;  %s545_s11 = smov %s472_s18 }
 0x24c   : > { %s546_s12 = smov %s461_s15  ;;  %14 = sbr.rel (!%p12_p2) target bundleno = 3 (0x3), region = 66 }
 0x251   :  { %243 = vsyncpa [#allocation3], 1 }
 0x252   :  { %245 = vsyncpa [#allocation3 + $0x1], 1 }

</bundles_post_ra>
